<compile_context>
chip_gen: v7x
topology: tpu7x:2x2x1
jax: 0.10.0
libtpu: 0.0.40
codegen_flags: <defaults>
</compile_context>

<pallas_src>
import functools

import jax
import jax.numpy as jnp
from jax.experimental import pallas as pl
from jax.experimental.pallas import tpu as pltpu

TEMPERATURE = 0.2
LOSS_WEIGHT = 1.0
NORM_EPS = 1e-12            # F.normalize default eps (clamp on the *norm*)


def _l2_normalize(x):
    # Clamping sum-of-squares at eps^2 == PyTorch's clamp of the norm at 1e-12.
    ss = jnp.sum(x * x, axis=-1, keepdims=True)
    return x * jax.lax.rsqrt(jnp.maximum(ss, NORM_EPS * NORM_EPS))


def _contrastive_kernel(q_ref, kt_ref, nt_ref, out_ref, l_scr, *, inv_temperature):
    """grid = (query tiles [parallel], negative tiles [arbitrary, last]).

    Inputs are pre-L2-normalized outside the kernel, so every logit is bounded
    by +/- 1/temperature; that static bound is the shift for the streamed
    sum-of-exp (no online running max / rescale needed).
    """
    ni = pl.program_id(1)
    bound = inv_temperature     # |cos| <= 1  ->  |logit| <= 1/T

    @pl.when(ni == 0)
    def _():
        l_scr[...] = jnp.zeros_like(l_scr)

    # (tq, tn) negative logits: natural (tq, d) x (d, tn) MXU form (negatives
    # streamed pre-transposed, lane-dense along tn), f32 accumulation.
    s_neg = jnp.dot(q_ref[...], nt_ref[...],
                    preferred_element_type=jnp.float32) * inv_temperature
    l_scr[...] += jnp.sum(jnp.exp(s_neg - bound), axis=-1, keepdims=True)

    @pl.when(ni == pl.num_programs(1) - 1)
    def _():
        s_key = jnp.dot(q_ref[...], kt_ref[...],
                        preferred_element_type=jnp.float32) * inv_temperature
        # CE with label 0:  lse([s_key, negatives...]) - s_key
        lse = bound + jnp.log(jnp.exp(s_key - bound) + l_scr[...])
        out_ref[...] = lse - s_key


def _pick_tile(total, target, align):
    """Largest multiple of `align` that divides `total` and is <= target;
    falls back to the full dimension (always a legal block shape)."""
    if total <= target:
        return total
    t = (target // align) * align
    while t >= align:
        if total % t == 0:
            return t
        t -= align
    return total


def _vmem_capacity_bytes():
    try:
        cap = getattr(pltpu.get_tpu_info(), "vmem_capacity_bytes", None)
        if cap:
            return int(cap)
    except Exception:
        pass
    return 64 * 1024 * 1024   # conservative (v7x per-TC)


def contrastive_loss(query, key, negatives, *, temperature=TEMPERATURE,
                     loss_weight=LOSS_WEIGHT, reduction='mean',
                     matmul_dtype=jnp.bfloat16, block_q=None, block_n=None):
    """Pallas forward of ContrastiveLoss.  Returns scalar for mean/sum."""
    assert reduction in ('none', 'mean', 'sum')
    nq, d = query.shape
    nk, dk = key.shape
    nn_, dn = negatives.shape
    assert d == dk == dn, "feature dims must match"

    # ---- XLA prologue: normalize once (f32), cast to MXU dtype, transpose
    # key/negatives so the kernel streams half the bytes and does no reshuffle.
    qn = _l2_normalize(query.astype(jnp.float32)).astype(matmul_dtype)
    kt = _l2_normalize(key.astype(jnp.float32)).astype(matmul_dtype).T        # (d, nk)
    nt = _l2_normalize(negatives.astype(jnp.float32)).astype(matmul_dtype).T  # (d, nn_)

    in_bytes = jnp.dtype(matmul_dtype).itemsize
    capacity = _vmem_capacity_bytes()
    small_vmem = capacity < 100 * 1024 * 1024       # v7x-class (64 MiB / TC)
    budget = (40 if small_vmem else 64) * 1024 * 1024
    vmem_limit = int(min(capacity, budget + 16 * 1024 * 1024))

    # tq is the HBM-reuse knob; tn only sets DMA granularity (cap at 512).
    tq_target = 384 if small_vmem else (512 if in_bytes <= 2 else 256)
    tn_target = 512

    def _vmem_need(tq, tn):
        # double-buffered in/out blocks + materialized (tq,tn) logits/exp temp
        # + (tq,nk) key-logits temp + scratch.
        return (in_bytes * (2 * tq * d + 2 * d * nk + 2 * d * tn)
                + 4 * (3 * tq * nk + 2 * tq * tn + 8 * tq))

    tq = block_q if block_q is not None else _pick_tile(nq, tq_target, 8)
    tn = block_n if block_n is not None else _pick_tile(nn_, tn_target, 128)
    if block_n is None:
        while tn > 128 and _vmem_need(tq, tn) > budget:
            new_tn = _pick_tile(nn_, max(128, tn // 2), 128)
            if new_tn >= tn:
                break
            tn = new_tn
    if block_q is None:
        while tq > 8 and _vmem_need(tq, tn) > budget:
            new_tq = _pick_tile(nq, max(8, tq // 2), 8)
            if new_tq >= tq:
                break
            tq = new_tq
        # v7x: 2 TensorCores shard the 'parallel' axis -> need >= 2 steps.
        if small_vmem and nq // tq < 2 and nq >= 16:
            tq = _pick_tile(nq, max(8, nq // 2), 8)

    if nq % tq or nn_ % tn:
        raise ValueError(f"block sizes ({tq},{tn}) must divide ({nq},{nn_})")

    grid = (nq // tq, nn_ // tn)
    n_qtiles = grid[0]
    kernel = functools.partial(_contrastive_kernel,
                               inv_temperature=1.0 / temperature)

    cost = pl.CostEstimate(
        flops=int(2 * nq * (nk + nn_) * d),
        transcendentals=int(nq * (nk + nn_)),
        # key/negatives are re-streamed once per query tile.
        bytes_accessed=int(in_bytes * (nq * d + n_qtiles * (nk + nn_) * d)
                           + 4 * nq * nk),
    )

    per_pair = pl.pallas_call(
        kernel,
        out_shape=jax.ShapeDtypeStruct((nq, nk), jnp.float32),
        grid_spec=pltpu.PrefetchScalarGridSpec(
            num_scalar_prefetch=0,
            grid=grid,
            in_specs=[
                pl.BlockSpec((tq, d), lambda qi, ni: (qi, 0)),   # query tile
                pl.BlockSpec((d, nk), lambda qi, ni: (0, 0)),    # full key^T
                pl.BlockSpec((d, tn), lambda qi, ni: (0, ni)),   # negatives^T tile
            ],
            out_specs=pl.BlockSpec((tq, nk), lambda qi, ni: (qi, 0)),
            scratch_shapes=[pltpu.VMEM((tq, 1), jnp.float32)],   # running sum-exp
        ),
        compiler_params=pltpu.CompilerParams(
            dimension_semantics=("parallel", "arbitrary"),
            vmem_limit_bytes=vmem_limit,
        ),
        cost_estimate=cost,
    )(qn, kt, nt)

    if reduction == 'mean':
        loss = jnp.mean(per_pair)
    elif reduction == 'sum':
        loss = jnp.sum(per_pair)
    else:
        # PyTorch flattens key-major: row index = k * num_query + q.
        loss = per_pair.T.reshape(-1)
    # TODO(synk): avg_factor passthrough of mmdet's CrossEntropyLoss not modeled.
    return loss * loss_weight


def _reference_loss(q, k, n, temperature=TEMPERATURE, loss_weight=LOSS_WEIGHT):
    """Pure-JAX mirror of the PyTorch forward for correctness checking."""
    norm = lambda x: x / jnp.maximum(
        jnp.linalg.norm(x, axis=-1, keepdims=True), NORM_EPS)
    qn, kn, nn_ = norm(q), norm(k), norm(n)
    num_key = k.shape[0]
    feats = jnp.concatenate(
        [kn[:, None, :],
         jnp.broadcast_to(nn_[None], (num_key,) + nn_.shape)], axis=1)
    qexp = jnp.broadcast_to(qn[None], (num_key,) + qn.shape)
    logits = jnp.einsum('bqd,bcd->bqc', qexp, feats) / temperature
    logits = logits.reshape(-1, logits.shape[-1])
    lse = jax.scipy.special.logsumexp(logits, axis=-1)
    return jnp.mean(lse - logits[:, 0]) * loss_weight


if __name__ == "__main__":
    rng = jax.random.PRNGKey(0)
    k1, k2, k3 = jax.random.split(rng, 3)

    # Small shapes consistent with the module: (num_samples, embed_dim).
    Nq, Nk, Nn, D = 16, 8, 256, 32
    query = jax.random.normal(k1, (Nq, D), dtype=jnp.float32)
    key = jax.random.normal(k2, (Nk, D), dtype=jnp.float32)
    negatives = jax.random.normal(k3, (Nn, D), dtype=jnp.float32)

    ref = _reference_loss(query, key, negatives)

    # 1) f32-matmul path, auto tiles: exact vs reference.
    loss_f32 = contrastive_loss(query, key, negatives, matmul_dtype=jnp.float32)
    jax.block_until_ready(loss_f32)
    assert jnp.allclose(loss_f32, ref, atol=2e-5, rtol=2e-5), (loss_f32, ref)

    # 2) forced multi-step grid on both axes: exercises the streamed sum-of-exp
    #    accumulator and the resident output block.
    loss_tiled = contrastive_loss(query, key, negatives,
                                  matmul_dtype=jnp.float32,
                                  block_q=8, block_n=128)
    jax.block_until_ready(loss_tiled)
    assert jnp.allclose(loss_tiled, ref, atol=2e-5, rtol=2e-5), (loss_tiled, ref)

    # 3) default production path (bf16 MXU operands, f32 accumulation).
    loss_bf16 = contrastive_loss(query, key, negatives)
    jax.block_until_ready(loss_bf16)
    assert jnp.allclose(loss_bf16, ref, atol=3e-2, rtol=3e-2), (loss_bf16, ref)

    print("KERNEL_OK")
</pallas_src>

<mosaic_0001>
module attributes {stable_mosaic.version = 11 : i64} {
  func.func @_contrastive_kernel(%arg0: i32, %arg1: i32, %arg2: memref<8x32xf32, #tpu.memory_space<vmem>>, %arg3: memref<32x8xf32, #tpu.memory_space<vmem>>, %arg4: memref<32x256xf32, #tpu.memory_space<vmem>>, %arg5: memref<8x8xf32, #tpu.memory_space<vmem>>, %arg6: memref<8x1xf32, #tpu.memory_space<vmem>>) attributes {dimension_semantics = [#tpu.dimension_semantics<parallel>, #tpu.dimension_semantics<arbitrary>], iteration_bounds = array<i64: 2, 1>, scalar_prefetch = 0 : i64, scratch_operands = 1 : i64, tpu.core_type = #tpu.core_type<tc>, window_params = [{transform_indices = @transform_0, window_bounds = array<i64: 8, 32>}, {pipeline_mode = #tpu.pipeline_mode<synchronous>, transform_indices = @transform_1, window_bounds = array<i64: 32, 8>}, {transform_indices = @transform_2, window_bounds = array<i64: 32, 256>}, {transform_indices = @transform_3, window_bounds = array<i64: 8, 8>}]} {
    %c0_i32 = arith.constant 0 : i32
    %0 = arith.cmpi eq, %arg1, %c0_i32 : i32
    %1 = arith.extui %0 : i1 to i32
    %c0_i32_0 = arith.constant 0 : i32
    %2 = arith.cmpi ne, %1, %c0_i32_0 : i32
    scf.if %2 {
      %cst_13 = arith.constant 0.000000e+00 : f32
      %19 = vector.broadcast %cst_13 : f32 to vector<8x1xf32>
      %c0_14 = arith.constant 0 : index
      %c0_15 = arith.constant 0 : index
      %20 = vector.load %arg6[%c0_14, %c0_15] : memref<8x1xf32, #tpu.memory_space<vmem>>, vector<8x1xf32>
      tpu.vector_store %arg6[%c0_14, %c0_15], %19 {strides = array<i32>} : memref<8x1xf32, #tpu.memory_space<vmem>>, vector<8x1xf32>,
    } else {
    }
    %c0 = arith.constant 0 : index
    %c0_1 = arith.constant 0 : index
    %3 = vector.load %arg2[%c0, %c0_1] : memref<8x32xf32, #tpu.memory_space<vmem>>, vector<8x32xf32>
    %c0_2 = arith.constant 0 : index
    %c0_3 = arith.constant 0 : index
    %4 = vector.load %arg4[%c0_2, %c0_3] : memref<32x256xf32, #tpu.memory_space<vmem>>, vector<32x256xf32>
    %cst = arith.constant dense<0.000000e+00> : vector<8x256xf32>
    %5 = tpu.matmul %3, %4, %cst {dimension_numbers = #tpu.dot_dimension_numbers<[1], [0], [0], [1], [0, 0, 1, 1], [], []>} : vector<8x32xf32>, vector<32x256xf32>, vector<8x256xf32> -> vector<8x256xf32>
    %cst_4 = arith.constant 5.000000e+00 : f32
    %6 = vector.broadcast %cst_4 : f32 to vector<8x256xf32>
    %7 = arith.mulf %5, %6 : vector<8x256xf32>
    %c0_5 = arith.constant 0 : index
    %c0_6 = arith.constant 0 : index
    %8 = vector.load %arg6[%c0_5, %c0_6] : memref<8x1xf32, #tpu.memory_space<vmem>>, vector<8x1xf32>
    %cst_7 = arith.constant 5.000000e+00 : f32
    %9 = vector.broadcast %cst_7 : f32 to vector<8x256xf32>
    %10 = arith.subf %7, %9 : vector<8x256xf32>
    %11 = math.exp %10 : vector<8x256xf32>
    %cst_8 = arith.constant dense<0.000000e+00> : vector<8xf32>
    %12 = vector.multi_reduction <add>, %11, %cst_8 [1] : vector<8x256xf32> to vector<8xf32>
    %13 = vector.shape_cast %12 : vector<8xf32> to vector<8x1xf32>
    %14 = arith.addf %8, %13 : vector<8x1xf32>
    %c0_9 = arith.constant 0 : index
    %c0_10 = arith.constant 0 : index
    %15 = vector.load %arg6[%c0_9, %c0_10] : memref<8x1xf32, #tpu.memory_space<vmem>>, vector<8x1xf32>
    tpu.vector_store %arg6[%c0_9, %c0_10], %14 {strides = array<i32>} : memref<8x1xf32, #tpu.memory_space<vmem>>, vector<8x1xf32>,
    %c0_i32_11 = arith.constant 0 : i32
    %16 = arith.cmpi eq, %arg1, %c0_i32_11 : i32
    %17 = arith.extui %16 : i1 to i32
    %c0_i32_12 = arith.constant 0 : i32
    %18 = arith.cmpi ne, %17, %c0_i32_12 : i32
    scf.if %18 {
      %c0_13 = arith.constant 0 : index
      %c0_14 = arith.constant 0 : index
      %19 = vector.load %arg2[%c0_13, %c0_14] : memref<8x32xf32, #tpu.memory_space<vmem>>, vector<8x32xf32>
      %c0_15 = arith.constant 0 : index
      %c0_16 = arith.constant 0 : index
      %20 = vector.load %arg3[%c0_15, %c0_16] : memref<32x8xf32, #tpu.memory_space<vmem>>, vector<32x8xf32>
      %cst_17 = arith.constant dense<0.000000e+00> : vector<8x8xf32>
      %21 = tpu.matmul %19, %20, %cst_17 {dimension_numbers = #tpu.dot_dimension_numbers<[1], [0], [0], [1], [0, 0, 1, 1], [], []>} : vector<8x32xf32>, vector<32x8xf32>, vector<8x8xf32> -> vector<8x8xf32>
      %cst_18 = arith.constant 5.000000e+00 : f32
      %22 = vector.broadcast %cst_18 : f32 to vector<8x8xf32>
      %23 = arith.mulf %21, %22 : vector<8x8xf32>
      %cst_19 = arith.constant 5.000000e+00 : f32
      %24 = vector.broadcast %cst_19 : f32 to vector<8x8xf32>
      %25 = arith.subf %23, %24 : vector<8x8xf32>
      %26 = math.exp %25 : vector<8x8xf32>
      %c0_20 = arith.constant 0 : index
      %c0_21 = arith.constant 0 : index
      %27 = vector.load %arg6[%c0_20, %c0_21] : memref<8x1xf32, #tpu.memory_space<vmem>>, vector<8x1xf32>
      %28 = vector.broadcast %27 : vector<8x1xf32> to vector<8x8xf32>
      %29 = arith.addf %26, %28 : vector<8x8xf32>
      %30 = math.log %29 : vector<8x8xf32>
      %cst_22 = arith.constant 5.000000e+00 : f32
      %31 = vector.broadcast %cst_22 : f32 to vector<8x8xf32>
      %32 = arith.addf %31, %30 : vector<8x8xf32>
      %33 = arith.subf %32, %23 : vector<8x8xf32>
      %c0_23 = arith.constant 0 : index
      %c0_24 = arith.constant 0 : index
      %34 = vector.load %arg5[%c0_23, %c0_24] : memref<8x8xf32, #tpu.memory_space<vmem>>, vector<8x8xf32>
      tpu.vector_store %arg5[%c0_23, %c0_24], %33 {strides = array<i32>} : memref<8x8xf32, #tpu.memory_space<vmem>>, vector<8x8xf32>,
    } else {
    }
    return
  }
  func.func @transform_0(%arg0: i32, %arg1: i32) -> (i32, i32) {
    %c0_i32 = arith.constant 0 : i32
    %c0_i32_0 = arith.constant 0 : i32
    return %arg0, %c0_i32 : i32, i32
  }
  func.func @transform_1(%arg0: i32, %arg1: i32) -> (i32, i32) {
    %c0_i32 = arith.constant 0 : i32
    %c0_i32_0 = arith.constant 0 : i32
    %c0_i32_1 = arith.constant 0 : i32
    return %c0_i32, %c0_i32_0 : i32, i32
  }
  func.func @transform_2(%arg0: i32, %arg1: i32) -> (i32, i32) {
    %c0_i32 = arith.constant 0 : i32
    %c0_i32_0 = arith.constant 0 : i32
    return %c0_i32, %arg1 : i32, i32
  }
  func.func @transform_3(%arg0: i32, %arg1: i32) -> (i32, i32) {
    %c0_i32 = arith.constant 0 : i32
    %c0_i32_0 = arith.constant 0 : i32
    return %arg0, %c0_i32 : i32, i32
  }
}

</mosaic_0001>

<bundles_post_ra>
// kernel: tpu_custom_call.1
= control target key start
LH: loop header
LB: loop body
LE: loop exit
PB: predicated region body
PF: predicated region fallthrough
CT: control target
= control target key end

     0   :  { %8 = vsyncpa [#allocation4], 0  ;;  %s660_s12 = smov 0   ;;  %s662_s13 = smov 0   ;;  %s757_s0 = inlined_call_operand.vmem [shape: f32[16,32], index: 0, kind: input, shape index: {}]   ;;  %s758_s1 = inlined_call_operand.vmem [shape: f32[32,8], index: 1, kind: input, shape index: {}]   ;;  %s759_s2 = inlined_call_operand.hbm [shape: f32[32,256], index: 2, kind: input, shape index: {}]   ;;  %s760_s3 = inlined_call_operand.vmem [shape: f32[16,8], index: 3, kind: output, shape index: {}]  }
   0x1   :  { %s664_s14 = smov 0  }
   0x2 LB: > { %s481_s15 = sadd.s32 4294967295, %s631_s14   ;;  %s26_s16 = sadd.s32 1, %s627_s13  ;;  %s631_s14 = sphi %s664_s14, %s14_s14   ;;  %s627_s13 = sphi %s662_s13, %s770_s13   ;;  %s623_s12 = sphi %s660_s12, %s769_s12  }
   0x3   : > { %p28_p0 = scmp.ge.s32.totalorder %s26_s16, 2  ;;  %p483_p1 = scmp.ge.s32.totalorder %s631_s14, 1 }
   0x4   : > { %p130_p2 = scmp.lt.s32.totalorder %s631_s14, 3  ;;  %p685_p4 = scmp.eq.s32.totalorder %s481_s15, 0 }
   0x5   : > { %s772_s16 = smov (%p28_p0, %s26_s16), 0  ;;  %s633_s19 = smov [#allocation3]  }
   0x6   : > { %p681_p3 = pnand %p483_p1, %p130_p2  ;;  %s148_s20 = sshll.u32 %s633_s19, 4  ;;  %s149_s20 = int_to_ptr.vmem [resolvable:$true] %s148_s20 }
   0x7   : > { %s765_s18 = scalar_select %p685_p4, 1, 0 }
   0x8   : > { %s764_s17 = scalar_select %p681_p3, 1, 0 }
   0x9   : > { %p531_p5 = pneg %p681_p3  ;;  %s577_s24 = scalar_lea.hbm %s759_s2, 1024 }
   0xa   : > { %p578_p7 = scmp.ne.s32.totalorder %s759_s2, %s577_s24  ;;  %p584_p11 = scmp.lt.u32.totalorder %s577_s24, %s759_s2 }
   0xb   : > { %p693_p6 = pnand %p685_p4, %p531_p5 }
   0xd   : > { %p579_p8 = pneg %p693_p6 }
   0xf   : > { %p580_p9 = pnand %p579_p8, %p578_p7 }
  0x11   : > { %p581_p10 = pneg %p580_p9 }
  0x13   : > { %p586_p12 = pnand %p584_p11, %p581_p10 }
  0x15   : > { %589 = shalt.err (!%p586_p12)
}
  0x16   : > { %s590_s29 = scalar_lea.vmem %s149_s20, 1024  ;;  %p598_p2 = scmp.lt.s32.totalorder %s149_s20, %s149_s20 }
  0x17   : > { %p591_p13 = scmp.ne.s32.totalorder %s149_s20, %s590_s29  ;;  %p599_p5 = scmp.lt.s32.totalorder %s590_s29, %s590_s29 }
  0x19   : > { %p593_p0 = pnand %p591_p13, %p579_p8  ;;  %p600_p4 = por %p599_p5, %p598_p2 }
  0x1b   : > { %p594_p1 = pneg %p593_p0 }
  0x1d   : > { %p601_p3 = pnand %p600_p4, %p594_p1 }
  0x1f   : > { %604 = shalt.err (!%p601_p3)
}
  0x20   : > { %s634_s30 = smov 256   ;;  %s635_s4 = smov 16  }
  0x21   : > { %534 = dma.hbm_to_vmem [thread:$0]  (!%p693_p6), %s759_s2, 1024, %s149_s20, [#allocation4], %s634_s30, %s634_s30, %s635_s4  }
  0x22   : > { %p767_p7 = scmp.ne.s32.totalorder %s764_s17, 0 }
  0x23   : > { %p768_p9 = scmp.ne.s32.totalorder (!%p767_p7), %s765_s18, 0 }
  0x24   : > { %171 = sbr.rel (%p767_p7) target bundleno = 588 (0x24c), region = 32 }
  0x2b   : > { %618 = dma.done.wait (%p768_p9), [#allocation4], 1024  }
  0x2c   : > { %620 = vsyncadd (%p768_p9), [#allocation4], 4294966272  ;;  %vm206_vm0 = vcmask 7168   ;;  %v636_v0 = vmov 0.0   ;;  %p193_p3 = scmp.lt.s32.totalorder %s623_s12, 1  ;;  %v210_v1 = vld [vmem:[#allocation3 + $0x8] sm:$0xff] }
  0x2d   : > { %207 = vst.msk [vmem:[#allocation2] sm:$0xff] %vm206_vm0, %v636_v0  ;;  %285 = vmatprep.mubr.f32.mxu0 %v636_v0  ;;  %v212_v2 = vld [vmem:[#allocation3 + $0x18] sm:$0xff]  ;;  %v209_v3 = vld [vmem:[#allocation3] sm:$0xff]  ;;  %v211_v5 = vld [vmem:[#allocation3 + $0x10] sm:$0xff]  ;;  %vm217_vm1 = vcmask 261120   ;;  %v637_v17 = vmov 0.0|0.0  }
  0x2e   : > { %s774_s12 = smov (!%p193_p3, %s623_s12), 1  ;;  %v513_v4 = vpack.c.bf16 %v212_v2, %v210_v1  ;;  %v214_v6 = vld [vmem:[#allocation3 + $0x28] sm:$0xff]  ;;  %v216_v7 = vld [vmem:[#allocation3 + $0x38] sm:$0xff]  ;;  %v515_v8 = vpack.c.bf16 %v211_v5, %v209_v3  ;;  %v213_v10 = vld [vmem:[#allocation3 + $0x20] sm:$0xff]  ;;  %521 = vmatprep.subr.bf16.mxu1 %v637_v17  ;;  %vm638_vm2 = vmmov 0   ;;  %v639_v32 = vmov 0  }
  0x2f   : > { %v517_v9 = vpack.c.bf16 %v216_v7, %v214_v6  ;;  %v215_v11 = vld [vmem:[#allocation3 + $0x30] sm:$0xff]  ;;  %s488_s7 = sshll.u32 %s774_s12, 3  ;;  %v311_v14 = vld [vmem:[%s758_s1] sm:$0xff]  ;;  %v312_v15 = vld [vmem:[%s758_s1 + $0x8] sm:$0xff]  ;;  %510 = vmatprep.mubr.msk.f32.mxu1 %vm638_vm2, %v636_v0  ;;  %568 = vset.pattern.permute.xlu0 %v639_v32  ;;  %vm403_vm3 = vcmask 64512  }
  0x30   : > { %514 = vmatprep.subr.bf16.mxu0 %v513_v4  ;;  %v519_v12 = vpack.c.bf16 %v215_v11, %v213_v10  ;;  %s196_s10 = scalar_lea.vmem %s757_s0, %s488_s7  ;;  %v313_v16 = vld [vmem:[%s758_s1 + $0x10] sm:$0xff]  ;;  %v522_v18 = vpack.c.bf16 %v312_v15, %v311_v14  ;;  %v314_v19 = vld [vmem:[%s758_s1 + $0x18] sm:$0xff]  ;;  %s201_s25 = scalar_lea.vmem %s760_s3, %s488_s7 }
  0x31   : > { %516 = vmatpush1.bf16.msra.mxu0 %v515_v8  ;;  %v208_v13 = vld [vmem:[%s196_s10] sm:$0xff]  ;;  %v525_v20 = vpack.c.bf16 %v314_v19, %v313_v16 }
  0x32   : > { %518 = vmatprep.subr.bf16.mxu0 %v517_v9  ;;  %523 = vmatpush3.bf16.msra.mxu1 %v522_v18 }
  0x33   : > { %524 = vmatprep.subr.bf16.mxu1 %v637_v17 }
  0x34   : > { %v294_v35 = vld [vmem:[#allocation2] sm:$0xff] }
  0x35   : > { %520 = vmatpush1.bf16.msra.mxu0 %v519_v12 }
  0x36   : > { %526 = vmatpush3.bf16.msra.mxu1 %v525_v20 }
  0x38   : > { %490 = vmatmul.mubr.msk.f32.vlgmr.msra.gmra.mrb[0].mxu0 %vm217_vm1, %v208_v13 }
  0x39   : > { %511 = vmatmul.mubr.msk.f32.vlgmr.msra.gmra.mrb[0].mxu1 %vm217_vm1, %v208_v13 }
 0x10b   : > { %v287_v21 = vpop.f32.mrb[0].mxu0 }
 0x10c   : > { %v292_v22 = vmul.f32 5.0, %v287_v21  ;;  %v289_v23 = vpop.f32.mrb[1].mxu0  ;;  %v384_v33 = vpop.f32.mrb[0].mxu1 }
 0x10d   : > { %v293_v24 = vmul.f32 5.0, %v289_v23  ;;  %v512_v34 = vpop.f32.mrb[1].mxu1  ;;  %v388_v39 = vmul.f32 5.0, %v384_v33 }
 0x10e   : > { %v491_v25 = vadd.f32 -5.0, %v292_v22 }
 0x10f   : > { %v492_v26 = vadd.f32 -5.0, %v293_v24  ;;  %v494_v40 = vadd.f32 -5.0, %v388_v39 }
 0x110   : > { %v297_v27 = vmul.f32 1.442695, %v491_v25 }
 0x111   : > { %v299_v28 = vmul.f32 1.442695, %v492_v26  ;;  %v390_v41 = vmul.f32 1.442695, %v494_v40 }
 0x112   : > { %569 = vpow2.f32 %v297_v27 }
 0x113   : > { %571 = vpow2.f32 %v299_v28 }
 0x114   : > { %573 = vpow2.f32 %v390_v41 }
 0x11c   : > { %v570_v29 = vpop.eup %569 }
 0x11d   : > { %v572_v30 = vpop.eup %571 }
 0x11e   : > { %v301_v31 = vadd.f32 %v572_v30, %v570_v29  ;;  %v574_v42 = vpop.eup %573 }
 0x120   : > { %302 = vadd.xlane.f32.xlu0 %v301_v31 }
 0x1ad   : > { %v303_v36 = vpop.xlane.xlu0 %302 }
 0x1ae   : > { %v304_v37 = vadd.f32 %v303_v36, %v294_v35 }
 0x1b0   : > { %306 = vst.msk [vmem:[#allocation2] sm:$0xff] %vm206_vm0, %v304_v37 }
 0x1b7   : > { %v392_v38 = vld [vmem:[#allocation2] sm:$0xff] }
 0x1b8   : > { %395 = vperm.xlu0 %568, %v392_v38  }
 0x237   : > { %v396_v43 = vpop.permute.xlu0 %395 }
 0x238   : > { %v398_v44 = vadd.f32 %v574_v42, %v396_v43 }
 0x23a   : > { %575 = vlog2.f32 %v398_v44 }
 0x244   : > { %v576_v45 = vpop.eup %575 }
 0x245   : > { %v400_v46 = vmul.f32 0.6931472, %v576_v45 }
 0x247   : > { %v401_v47 = vadd.f32 5.0, %v400_v46 }
 0x249   : > { %v402_v48 = vsub.f32 %v401_v47, %v388_v39 }
 0x24b   : > { %404 = vst.msk [vmem:[%s201_s25] sm:$0xff] %vm403_vm3, %v402_v48 }
 0x24c PF: > { %s14_s14 = sadd.s32 1, %s631_s14   ;;  %s769_s12 = smov %s627_s13 }
 0x24d   : > { %p11_p4 = scmp.ge.s32.totalorder %s14_s14, 4   ;;  %s770_s13 = smov %s772_s16 }
 0x24f   :  { %13 = sbr.rel (!%p11_p4) target bundleno = 2 (0x2), region = 76 }
 0x256   :  { %424 = vsyncpa [#allocation4], 1 }
 0x257   :  { %426 = vsyncpa [#allocation4 + $0x1], 1 }

</bundles_post_ra>
